<compile_context>
chip_gen: v7x
topology: tpu7x:2x2x1
jax: 0.10.0
libtpu: 0.0.40
codegen_flags: <defaults>
</compile_context>

<pallas_src>
import functools
import numpy as np

import jax
import jax.numpy as jnp
from jax.experimental import pallas as pl
from jax.experimental.pallas import tpu as pltpu

EPS = 1e-5                       # PyTorch BatchNorm2d / InstanceNorm2d default eps
VMEM_LIMIT = 32 * 1024 * 1024    # explicit VMEM budget (safe on v5e/v6e/v7x)


def _round_up(v, m):
    return ((v + m - 1) // m) * m


# ----------------------------------------------------------------------------
# Pallas kernels
# ----------------------------------------------------------------------------
def _matmul_bias_kernel(a_ref, b_ref, bias_ref, o_ref, acc_ref):
    @pl.when(pl.program_id(2) == 0)
    def _():
        acc_ref[...] = jnp.zeros_like(acc_ref)

    acc_ref[...] += jnp.dot(a_ref[...], b_ref[...],
                            preferred_element_type=jnp.float32)

    @pl.when(pl.program_id(2) == pl.num_programs(2) - 1)
    def _():
        o_ref[...] = (acc_ref[...] + bias_ref[...]).astype(o_ref.dtype)


def pallas_matmul(a, b, bias=None):
    """(M,K)@(K,N) (+bias) -> (M,N) float32. bf16 MXU operands, f32 accumulation."""
    M, K = a.shape
    K2, N = b.shape
    assert K == K2
    tm = min(256, _round_up(M, 128))
    tn = min(256, _round_up(N, 128))
    tk = min(512, _round_up(K, 128))
    Mp, Kp, Np = _round_up(M, tm), _round_up(K, tk), _round_up(N, tn)

    a_p = a.astype(jnp.bfloat16)
    b_p = b.astype(jnp.bfloat16)
    if (Mp, Kp) != (M, K):
        a_p = jnp.pad(a_p, ((0, Mp - M), (0, Kp - K)))
    if (Kp, Np) != (K, N):
        b_p = jnp.pad(b_p, ((0, Kp - K), (0, Np - N)))
    if bias is None:
        bias_p = jnp.zeros((1, Np), jnp.float32)
    else:
        bias_p = jnp.pad(bias.astype(jnp.float32).reshape(1, N),
                         ((0, 0), (0, Np - N)))

    out = pl.pallas_call(
        _matmul_bias_kernel,
        out_shape=jax.ShapeDtypeStruct((Mp, Np), jnp.float32),
        grid_spec=pltpu.PrefetchScalarGridSpec(
            num_scalar_prefetch=0,
            grid=(Mp // tm, Np // tn, Kp // tk),
            in_specs=[pl.BlockSpec((tm, tk), lambda i, j, k: (i, k)),
                      pl.BlockSpec((tk, tn), lambda i, j, k: (k, j)),
                      pl.BlockSpec((1, tn), lambda i, j, k: (0, j))],
            out_specs=pl.BlockSpec((tm, tn), lambda i, j, k: (i, j)),
            scratch_shapes=[pltpu.VMEM((tm, tn), jnp.float32)]),
        compiler_params=pltpu.CompilerParams(
            dimension_semantics=("parallel", "parallel", "arbitrary"),
            vmem_limit_bytes=VMEM_LIMIT),
    )(a_p, b_p, bias_p)
    return out[:M, :N]


def _apply_act(y, act):
    if act == "relu":
        return jnp.maximum(y, 0.0)
    if act == "relu6":
        return jnp.clip(y, 0.0, 6.0)
    if act == "sigmoid":
        return 1.0 / (1.0 + jnp.exp(-y))
    return y


def _ssact_kernel(x_ref, s_ref, t_ref, o_ref, *, act):
    # x: (1, tr, C); s/t: (1, 1, C) broadcast in-kernel (no full-size HBM broadcast)
    y = x_ref[...] * s_ref[...] + t_ref[...]
    o_ref[...] = _apply_act(y, act)


def _act_kernel(x_ref, o_ref, *, act):
    o_ref[...] = _apply_act(x_ref[...], act)


def _dwconv_kernel(x_ref, w_ref, o_ref):
    # x: (taps, tr, C) bf16, w: (taps, 1, C) f32, out: (tr, C) f32
    taps = x_ref.shape[0]
    acc = x_ref[0].astype(jnp.float32) * w_ref[0]
    for t in range(1, taps):
        acc = acc + x_ref[t].astype(jnp.float32) * w_ref[t]
    o_ref[...] = acc


# ----------------------------------------------------------------------------
# Elementwise wrappers (gridded, pipelined)
# ----------------------------------------------------------------------------
def _ew_row_tile(R, C, bytes_per_elem=4, target=2 << 20):
    tr = max(8, min(1024, (target // max(1, C * bytes_per_elem)) // 8 * 8))
    return min(tr, _round_up(R, 8))


def _norm_param(p, N, C):
    """Normalize scale/shift to shape (N, 1, C) float32."""
    p = jnp.asarray(p, jnp.float32)
    if p.size == 1:
        return jnp.full((N, 1, C), p.reshape(()), jnp.float32)
    if p.size == C:
        return jnp.broadcast_to(p.reshape(1, 1, C), (N, 1, C))
    return p.reshape(N, 1, C)


def scale_shift_act(x, scale, shift, act="none"):
    """Fused y = act(x * scale + shift), per-sample per-channel scale/shift."""
    orig = x.shape
    N, C = orig[0], orig[-1]
    R = 1
    for d in orig[1:-1]:
        R *= d
    x3 = x.reshape(N, R, C).astype(jnp.float32)
    s3 = _norm_param(scale, N, C)
    t3 = _norm_param(shift, N, C)

    tr = _ew_row_tile(R, C)
    Rp = _round_up(R, tr)
    if Rp != R:
        x3 = jnp.pad(x3, ((0, 0), (0, Rp - R), (0, 0)))

    out = pl.pallas_call(
        functools.partial(_ssact_kernel, act=act),
        out_shape=jax.ShapeDtypeStruct((N, Rp, C), jnp.float32),
        grid_spec=pltpu.PrefetchScalarGridSpec(
            num_scalar_prefetch=0,
            grid=(N, Rp // tr),
            in_specs=[pl.BlockSpec((1, tr, C), lambda n, r: (n, r, 0)),
                      pl.BlockSpec((1, 1, C), lambda n, r: (n, 0, 0)),
                      pl.BlockSpec((1, 1, C), lambda n, r: (n, 0, 0))],
            out_specs=pl.BlockSpec((1, tr, C), lambda n, r: (n, r, 0))),
        compiler_params=pltpu.CompilerParams(
            dimension_semantics=("parallel", "parallel"),
            vmem_limit_bytes=VMEM_LIMIT),
    )(x3, s3, t3)
    return out[:, :R, :].reshape(orig)


def act2d(x, act):
    """Unary activation on a 2D array, tiled over rows (lane-dense last dim)."""
    R, C = x.shape
    x = x.astype(jnp.float32)
    tr = _ew_row_tile(R, C)
    Rp = _round_up(R, tr)
    if Rp != R:
        x = jnp.pad(x, ((0, Rp - R), (0, 0)))
    out = pl.pallas_call(
        functools.partial(_act_kernel, act=act),
        out_shape=jax.ShapeDtypeStruct((Rp, C), jnp.float32),
        grid_spec=pltpu.PrefetchScalarGridSpec(
            num_scalar_prefetch=0,
            grid=(Rp // tr,),
            in_specs=[pl.BlockSpec((tr, C), lambda r: (r, 0))],
            out_specs=pl.BlockSpec((tr, C), lambda r: (r, 0))),
        compiler_params=pltpu.CompilerParams(
            dimension_semantics=("parallel",),
            vmem_limit_bytes=VMEM_LIMIT),
    )(x)
    return out[:R]


def sigmoid_pred(y):
    """Lane-dense sigmoid for (N,H,W,1) prediction maps (W on the lane axis)."""
    N, H, W, _ = y.shape
    return act2d(y.reshape(N * H, W), "sigmoid").reshape(N, H, W, 1)


# ----------------------------------------------------------------------------
# Conv / norm building blocks (NHWC)
# ----------------------------------------------------------------------------
def conv2d(x, w, b, stride, padding):
    """Dense conv: bf16 im2col + Pallas MXU matmul with fused bias."""
    N, H, W, Cin = x.shape
    kh, kw, _, Cout = w.shape
    Ho = (H + 2 * padding - kh) // stride + 1
    Wo = (W + 2 * padding - kw) // stride + 1
    xp = x.astype(jnp.bfloat16)
    if padding:
        xp = jnp.pad(xp, ((0, 0), (padding, padding), (padding, padding), (0, 0)))
    if kh == 1 and kw == 1 and stride == 1:
        patches = xp.reshape(N * Ho * Wo, Cin)         # pointwise: no im2col copy
    else:
        cols = [xp[:, dy:dy + stride * Ho:stride, dx:dx + stride * Wo:stride, :]
                for dy in range(kh) for dx in range(kw)]
        patches = jnp.concatenate(cols, -1).reshape(N * Ho * Wo, kh * kw * Cin)
    out = pallas_matmul(patches, w.reshape(kh * kw * Cin, Cout), bias=b)
    return out.reshape(N, Ho, Wo, Cout)


def depthwise_conv2d(x, w, stride, padding):
    """Depthwise conv: bf16 shifted slabs + row-tiled Pallas MAC kernel. w:(kh,kw,C)."""
    N, H, W, C = x.shape
    kh, kw, _ = w.shape
    taps = kh * kw
    Ho = (H + 2 * padding - kh) // stride + 1
    Wo = (W + 2 * padding - kw) // stride + 1
    xp = jnp.pad(x, ((0, 0), (padding, padding), (padding, padding),
                     (0, 0))).astype(jnp.bfloat16)
    R = N * Ho * Wo
    slabs = [xp[:, dy:dy + stride * Ho:stride, dx:dx + stride * Wo:stride, :]
             .reshape(R, C) for dy in range(kh) for dx in range(kw)]
    xs = jnp.stack(slabs, axis=0)                      # (taps, R, C) bf16

    tr = max(8, min(1024, ((4 << 20) // max(1, taps * C * 2)) // 8 * 8))
    tr = min(tr, _round_up(R, 8))
    Rp = _round_up(R, tr)
    if Rp != R:
        xs = jnp.pad(xs, ((0, 0), (0, Rp - R), (0, 0)))
    ws = w.reshape(taps, 1, C).astype(jnp.float32)

    out = pl.pallas_call(
        _dwconv_kernel,
        out_shape=jax.ShapeDtypeStruct((Rp, C), jnp.float32),
        grid_spec=pltpu.PrefetchScalarGridSpec(
            num_scalar_prefetch=0,
            grid=(Rp // tr,),
            in_specs=[pl.BlockSpec((taps, tr, C), lambda r: (0, r, 0)),
                      pl.BlockSpec((taps, 1, C), lambda r: (0, 0, 0))],
            out_specs=pl.BlockSpec((tr, C), lambda r: (r, 0))),
        compiler_params=pltpu.CompilerParams(
            dimension_semantics=("parallel",),
            vmem_limit_bytes=VMEM_LIMIT),
    )(xs, ws)
    return out[:R].reshape(N, Ho, Wo, C)


def bn_scale_shift(x, gamma, beta):
    # TODO(synk): training-mode BatchNorm (batch statistics, biased var), matching
    # the default PyTorch module state; eval() parity would use running stats.
    mean = jnp.mean(x, axis=(0, 1, 2))
    var = jnp.mean(jnp.square(x - mean), axis=(0, 1, 2))
    scale = gamma / jnp.sqrt(var + EPS)
    shift = beta - mean * scale
    return scale, shift                                # (C,)


def in_scale_shift(x):
    # InstanceNorm2d(affine=False)
    mean = jnp.mean(x, axis=(1, 2), keepdims=True)
    var = jnp.mean(jnp.square(x - mean), axis=(1, 2), keepdims=True)
    scale = 1.0 / jnp.sqrt(var + EPS)
    shift = -mean * scale
    return scale, shift                                # (N,1,1,C)


def conv_ibn_relu(p, x, stride, padding, with_ibn=True, with_relu=True):
    y = conv2d(x, p["w"], p.get("b"), stride, padding)
    act = "relu" if with_relu else "none"
    if with_ibn:
        C = y.shape[-1]
        bc = C // 2
        yb, yi = y[..., :bc], y[..., bc:]
        s, t = bn_scale_shift(yb, p["bn_g"], p["bn_b"])
        yb = scale_shift_act(yb, s, t, act)
        s, t = in_scale_shift(yi)
        yi = scale_shift_act(yi, s, t, act)
        return jnp.concatenate([yb, yi], axis=-1)
    if with_relu:
        N, H, W, C = y.shape
        return act2d(y.reshape(N * H * W, C), "relu").reshape(y.shape)
    return y


def resize_bilinear(x, out_h, out_w):
    # Bilinear F.interpolate(align_corners=False); plain-JAX glue.
    # Row gathers are done once per axis (not duplicated).
    N, H, W, C = x.shape

    def coords(out_size, in_size):
        scale = in_size / out_size
        c = (jnp.arange(out_size, dtype=jnp.float32) + 0.5) * scale - 0.5
        c = jnp.maximum(c, 0.0)
        i0 = jnp.minimum(jnp.floor(c).astype(jnp.int32), in_size - 1)
        i1 = jnp.minimum(i0 + 1, in_size - 1)
        return i0, i1, c - i0.astype(jnp.float32)

    y0, y1, fy = coords(out_h, H)
    x0, x1, fx = coords(out_w, W)
    fy = fy[None, :, None, None]
    fx = fx[None, None, :, None]

    rows0 = jnp.take(x, y0, axis=1)
    rows1 = jnp.take(x, y1, axis=1)

    def lerp_w(rows):
        a = jnp.take(rows, x0, axis=2)
        b = jnp.take(rows, x1, axis=2)
        return a * (1.0 - fx) + b * fx

    top = lerp_w(rows0)
    bot = lerp_w(rows1)
    return top * (1.0 - fy) + bot * fy


# ----------------------------------------------------------------------------
# Deterministic parameter construction
# ----------------------------------------------------------------------------
class KeyGen:
    def __init__(self, seed):
        self._key = jax.random.PRNGKey(seed)

    def __call__(self):
        self._key, k = jax.random.split(self._key)
        return k


def _kaiming(key, shape, fan_in):
    bound = np.sqrt(6.0 / fan_in)  # kaiming_uniform_, a=0, fan_in, relu
    return jax.random.uniform(key, shape, jnp.float32, -bound, bound)


def make_conv(kg, k, cin, cout, groups=1, bias=True):
    fan_in = (cin // groups) * k * k
    p = {"w": _kaiming(kg(), (k, k, cin // groups, cout), fan_in)}
    if bias:
        p["b"] = jnp.zeros((cout,), jnp.float32)       # nn.init.constant_(bias, 0)
    return p


def make_bn(c):
    return jnp.ones((c,), jnp.float32), jnp.zeros((c,), jnp.float32)


def make_cibr(kg, cin, cout, k, with_ibn=True):
    p = make_conv(kg, k, cin, cout, bias=True)
    if with_ibn:
        bc = cout // 2
        p["bn_g"], p["bn_b"] = make_bn(bc)
    return p


def make_ir(kg, inp, oup, stride, expansion):
    hidden = int(round(inp * expansion))
    p = {"stride": stride, "use_res": (stride == 1 and inp == oup)}
    if expansion != 1:
        p["pw1_w"] = make_conv(kg, 1, inp, hidden, bias=False)["w"]
        p["bn1_g"], p["bn1_b"] = make_bn(hidden)
    p["dw_w"] = _kaiming(kg(), (3, 3, hidden), 9)
    p["bn2_g"], p["bn2_b"] = make_bn(hidden)
    p["pw2_w"] = make_conv(kg, 1, hidden, oup, bias=False)["w"]
    p["bn3_g"], p["bn3_b"] = make_bn(oup)
    return p


def make_backbone(kg, in_channels=3):
    feats = []
    g, b = make_bn(32)
    feats.append({"type": "conv_bn", "stride": 2,
                  "w": make_conv(kg, 3, in_channels, 32, bias=False)["w"],
                  "bn_g": g, "bn_b": b})
    settings = [[1, 16, 1, 1], [6, 24, 2, 2], [6, 32, 3, 2], [6, 64, 4, 2],
                [6, 96, 3, 1], [6, 160, 3, 2], [6, 320, 1, 1]]
    inp = 32
    for t, c, n, s in settings:
        for i in range(n):
            ir = make_ir(kg, inp, c, s if i == 0 else 1, t)
            ir["type"] = "ir"
            feats.append(ir)
            inp = c
    g, b = make_bn(1280)
    feats.append({"type": "conv1x1_bn",
                  "w": make_conv(kg, 1, inp, 1280, bias=False)["w"],
                  "bn_g": g, "bn_b": b})
    return feats


def make_lr_branch(kg, ec):
    c = ec[4]
    return {"se_fc1": _kaiming(kg(), (c, c // 4), c),
            "se_fc2": _kaiming(kg(), (c // 4, c), c // 4),
            "conv_lr16x": make_cibr(kg, ec[4], ec[3], 5),
            "conv_lr8x": make_cibr(kg, ec[3], ec[2], 5),
            "conv_lr": make_cibr(kg, ec[2], 1, 3, with_ibn=False)}


def make_hr_branch(kg, hr, ec):
    return {"tohr_enc2x": make_cibr(kg, ec[0], hr, 1),
            "conv_enc2x": make_cibr(kg, hr + 3, hr, 3),
            "tohr_enc4x": make_cibr(kg, ec[1], hr, 1),
            "conv_enc4x": make_cibr(kg, 2 * hr, 2 * hr, 3),
            "conv_hr4x": [make_cibr(kg, 3 * hr + 3, 2 * hr, 3),
                          make_cibr(kg, 2 * hr, 2 * hr, 3),
                          make_cibr(kg, 2 * hr, hr, 3)],
            "conv_hr2x": [make_cibr(kg, 2 * hr, 2 * hr, 3),
                          make_cibr(kg, 2 * hr, hr, 3),
                          make_cibr(kg, hr, hr, 3),
                          make_cibr(kg, hr, hr, 3)],
            "conv_hr": [make_cibr(kg, hr + 3, hr, 3),
                        make_cibr(kg, hr, 1, 1, with_ibn=False)]}


def make_f_branch(kg, hr, ec):
    return {"conv_lr4x": make_cibr(kg, ec[2], hr, 5),
            "conv_f2x": make_cibr(kg, 2 * hr, hr, 3),
            "conv_f": [make_cibr(kg, hr + 3, hr // 2, 3),
                       make_cibr(kg, hr // 2, 1, 1, with_ibn=False)]}


# ----------------------------------------------------------------------------
# Forward passes
# ----------------------------------------------------------------------------
def conv_bn_relu6(p, x, stride, padding):
    y = conv2d(x, p["w"], None, stride, padding)
    s, t = bn_scale_shift(y, p["bn_g"], p["bn_b"])
    return scale_shift_act(y, s, t, "relu6")


def conv1x1_bn_relu6(p, x):
    y = conv2d(x, p["w"], None, 1, 0)
    s, t = bn_scale_shift(y, p["bn_g"], p["bn_b"])
    return scale_shift_act(y, s, t, "relu6")


def inverted_residual_fwd(p, x):
    y = x
    if "pw1_w" in p:
        y = conv2d(y, p["pw1_w"], None, 1, 0)
        s, t = bn_scale_shift(y, p["bn1_g"], p["bn1_b"])
        y = scale_shift_act(y, s, t, "relu6")
    y = depthwise_conv2d(y, p["dw_w"], p["stride"], 1)
    s, t = bn_scale_shift(y, p["bn2_g"], p["bn2_b"])
    y = scale_shift_act(y, s, t, "relu6")
    y = conv2d(y, p["pw2_w"], None, 1, 0)
    s, t = bn_scale_shift(y, p["bn3_g"], p["bn3_b"])
    y = scale_shift_act(y, s, t, "none")
    return x + y if p["use_res"] else y


def backbone_fwd(feats, x):
    x = conv_bn_relu6(feats[0], x, 2, 1)
    x = inverted_residual_fwd(feats[1], x)
    enc2x = x
    x = inverted_residual_fwd(feats[2], x)
    x = inverted_residual_fwd(feats[3], x)
    enc4x = x
    for i in range(4, 7):
        x = inverted_residual_fwd(feats[i], x)
    enc8x = x
    for i in range(7, 14):
        x = inverted_residual_fwd(feats[i], x)
    enc16x = x
    for i in range(14, 18):
        x = inverted_residual_fwd(feats[i], x)
    x = conv1x1_bn_relu6(feats[18], x)
    enc32x = x
    return [enc2x, enc4x, enc8x, enc16x, enc32x]


def se_block_fwd(fc1, fc2, x):
    # Tiny (batch x C) matmuls: plain XLA dot is faster than a padded MXU call.
    w = jnp.mean(x, axis=(1, 2))                       # AdaptiveAvgPool2d(1)
    h = jax.nn.relu(jnp.dot(w, fc1))
    h = jax.nn.sigmoid(jnp.dot(h, fc2))
    return scale_shift_act(x, h, 0.0, "none")          # x * w (Pallas, gridded)


def lr_branch_fwd(p, feats, img, inference):
    enc = backbone_fwd(feats, img)
    enc2x, enc4x, enc32x = enc[0], enc[1], enc[4]
    enc32x = se_block_fwd(p["se_fc1"], p["se_fc2"], enc32x)
    lr16x = resize_bilinear(enc32x, enc32x.shape[1] * 2, enc32x.shape[2] * 2)
    lr16x = conv_ibn_relu(p["conv_lr16x"], lr16x, 1, 2)
    lr8x = resize_bilinear(lr16x, lr16x.shape[1] * 2, lr16x.shape[2] * 2)
    lr8x = conv_ibn_relu(p["conv_lr8x"], lr8x, 1, 2)
    pred_semantic = None
    if not inference:
        lr = conv_ibn_relu(p["conv_lr"], lr8x, 2, 1, with_ibn=False, with_relu=False)
        pred_semantic = sigmoid_pred(lr)
    return pred_semantic, lr8x, enc2x, enc4x


def hr_branch_fwd(p, img, enc2x, enc4x, lr8x, inference):
    N, H, W, _ = img.shape
    img2x = resize_bilinear(img, H // 2, W // 2)
    img4x = resize_bilinear(img, H // 4, W // 4)
    enc2x = conv_ibn_relu(p["tohr_enc2x"], enc2x, 1, 0)
    hr4x = conv_ibn_relu(p["conv_enc2x"], jnp.concatenate([img2x, enc2x], -1), 2, 1)
    enc4x = conv_ibn_relu(p["tohr_enc4x"], enc4x, 1, 0)
    hr4x = conv_ibn_relu(p["conv_enc4x"], jnp.concatenate([hr4x, enc4x], -1), 1, 1)
    lr4x = resize_bilinear(lr8x, lr8x.shape[1] * 2, lr8x.shape[2] * 2)
    hr4x = jnp.concatenate([hr4x, lr4x, img4x], -1)
    for q in p["conv_hr4x"]:
        hr4x = conv_ibn_relu(q, hr4x, 1, 1)
    hr2x = resize_bilinear(hr4x, hr4x.shape[1] * 2, hr4x.shape[2] * 2)
    hr2x = jnp.concatenate([hr2x, enc2x], -1)
    for q in p["conv_hr2x"]:
        hr2x = conv_ibn_relu(q, hr2x, 1, 1)
    pred_detail = None
    if not inference:
        hr = resize_bilinear(hr2x, H, W)
        hr = jnp.concatenate([hr, img], -1)
        hr = conv_ibn_relu(p["conv_hr"][0], hr, 1, 1)
        hr = conv_ibn_relu(p["conv_hr"][1], hr, 1, 0, with_ibn=False, with_relu=False)
        pred_detail = sigmoid_pred(hr)
    return pred_detail, hr2x


def f_branch_fwd(p, img, lr8x, hr2x):
    lr4x = resize_bilinear(lr8x, lr8x.shape[1] * 2, lr8x.shape[2] * 2)
    lr4x = conv_ibn_relu(p["conv_lr4x"], lr4x, 1, 2)
    lr2x = resize_bilinear(lr4x, lr4x.shape[1] * 2, lr4x.shape[2] * 2)
    f2x = conv_ibn_relu(p["conv_f2x"], jnp.concatenate([lr2x, hr2x], -1), 1, 1)
    f = resize_bilinear(f2x, f2x.shape[1] * 2, f2x.shape[2] * 2)
    f = jnp.concatenate([f, img], -1)
    f = conv_ibn_relu(p["conv_f"][0], f, 1, 1)
    f = conv_ibn_relu(p["conv_f"][1], f, 1, 0, with_ibn=False, with_relu=False)
    return sigmoid_pred(f)


def modnet_forward(params, img_nchw, inference=False):
    # Input is NCHW (PyTorch); transposed to NHWC for all kernels, outputs back to NCHW.
    img = jnp.transpose(img_nchw, (0, 2, 3, 1)).astype(jnp.float32)
    pred_semantic, lr8x, enc2x, enc4x = lr_branch_fwd(
        params["lr"], params["backbone"], img, inference)
    pred_detail, hr2x = hr_branch_fwd(
        params["hr"], img, enc2x, enc4x, lr8x, inference)
    pred_matte = f_branch_fwd(params["f"], img, lr8x, hr2x)
    to_nchw = lambda y: None if y is None else jnp.transpose(y, (0, 3, 1, 2))
    return to_nchw(pred_semantic), to_nchw(pred_detail), to_nchw(pred_matte)


# ----------------------------------------------------------------------------
if __name__ == "__main__":
    enc_channels = [16, 24, 32, 96, 1280]
    hr_channels = 32
    kg = KeyGen(0)
    params = {"backbone": make_backbone(kg, 3),
              "lr": make_lr_branch(kg, enc_channels),
              "hr": make_hr_branch(kg, hr_channels, enc_channels),
              "f": make_f_branch(kg, hr_channels, enc_channels)}

    img = jax.random.normal(jax.random.PRNGKey(0), (1, 3, 32, 32), jnp.float32)
    pred_semantic, pred_detail, pred_matte = modnet_forward(params, img, inference=False)
    jax.block_until_ready((pred_semantic, pred_detail, pred_matte))

    assert pred_semantic.shape == (1, 1, 2, 2)       # H/16
    assert pred_detail.shape == (1, 1, 32, 32)       # full resolution
    assert pred_matte.shape == (1, 1, 32, 32)        # full resolution
    assert bool(jnp.all(jnp.isfinite(pred_semantic)))
    assert bool(jnp.all(jnp.isfinite(pred_detail)))
    assert bool(jnp.all(jnp.isfinite(pred_matte)))
    print("KERNEL_OK")
</pallas_src>

<mosaic_0001>
module attributes {stable_mosaic.version = 11 : i64} {
  func.func @_matmul_bias_kernel(%arg0: i32, %arg1: i32, %arg2: i32, %arg3: memref<256x128xbf16, #tpu.memory_space<vmem>>, %arg4: memref<128x128xbf16, #tpu.memory_space<vmem>>, %arg5: memref<1x128xf32, #tpu.memory_space<vmem>>, %arg6: memref<256x128xf32, #tpu.memory_space<vmem>>, %arg7: memref<256x128xf32, #tpu.memory_space<vmem>>) attributes {dimension_semantics = [#tpu.dimension_semantics<parallel>, #tpu.dimension_semantics<parallel>, #tpu.dimension_semantics<arbitrary>], iteration_bounds = array<i64: 1, 1, 1>, scalar_prefetch = 0 : i64, scratch_operands = 1 : i64, tpu.core_type = #tpu.core_type<tc>, window_params = [{transform_indices = @transform_0, window_bounds = array<i64: 256, 128>}, {transform_indices = @transform_1, window_bounds = array<i64: 128, 128>}, {transform_indices = @transform_2, window_bounds = array<i64: 1, 128>}, {transform_indices = @transform_3, window_bounds = array<i64: 256, 128>}]} {
    %c0_i32 = arith.constant 0 : i32
    %0 = arith.cmpi eq, %arg2, %c0_i32 : i32
    %1 = arith.extui %0 : i1 to i32
    %c0_i32_0 = arith.constant 0 : i32
    %2 = arith.cmpi ne, %1, %c0_i32_0 : i32
    scf.if %2 {
      %cst_10 = arith.constant 0.000000e+00 : f32
      %12 = vector.broadcast %cst_10 : f32 to vector<256x128xf32>
      %c0_11 = arith.constant 0 : index
      %c0_12 = arith.constant 0 : index
      %13 = vector.load %arg7[%c0_11, %c0_12] : memref<256x128xf32, #tpu.memory_space<vmem>>, vector<256x128xf32>
      tpu.vector_store %arg7[%c0_11, %c0_12], %12 {strides = array<i32>} : memref<256x128xf32, #tpu.memory_space<vmem>>, vector<256x128xf32>,
    } else {
    }
    %c0 = arith.constant 0 : index
    %c0_1 = arith.constant 0 : index
    %3 = vector.load %arg7[%c0, %c0_1] : memref<256x128xf32, #tpu.memory_space<vmem>>, vector<256x128xf32>
    %c0_2 = arith.constant 0 : index
    %c0_3 = arith.constant 0 : index
    %4 = vector.load %arg3[%c0_2, %c0_3] : memref<256x128xbf16, #tpu.memory_space<vmem>>, vector<256x128xbf16>
    %c0_4 = arith.constant 0 : index
    %c0_5 = arith.constant 0 : index
    %5 = vector.load %arg4[%c0_4, %c0_5] : memref<128x128xbf16, #tpu.memory_space<vmem>>, vector<128x128xbf16>
    %cst = arith.constant dense<0.000000e+00> : vector<256x128xf32>
    %6 = tpu.matmul %4, %5, %cst {dimension_numbers = #tpu.dot_dimension_numbers<[1], [0], [0], [1], [0, 0, 1, 1], [], []>} : vector<256x128xbf16>, vector<128x128xbf16>, vector<256x128xf32> -> vector<256x128xf32>
    %7 = arith.addf %3, %6 : vector<256x128xf32>
    %c0_6 = arith.constant 0 : index
    %c0_7 = arith.constant 0 : index
    %8 = vector.load %arg7[%c0_6, %c0_7] : memref<256x128xf32, #tpu.memory_space<vmem>>, vector<256x128xf32>
    tpu.vector_store %arg7[%c0_6, %c0_7], %7 {strides = array<i32>} : memref<256x128xf32, #tpu.memory_space<vmem>>, vector<256x128xf32>,
    %c0_i32_8 = arith.constant 0 : i32
    %9 = arith.cmpi eq, %arg2, %c0_i32_8 : i32
    %10 = arith.extui %9 : i1 to i32
    %c0_i32_9 = arith.constant 0 : i32
    %11 = arith.cmpi ne, %10, %c0_i32_9 : i32
    scf.if %11 {
      %c0_10 = arith.constant 0 : index
      %c0_11 = arith.constant 0 : index
      %12 = vector.load %arg7[%c0_10, %c0_11] : memref<256x128xf32, #tpu.memory_space<vmem>>, vector<256x128xf32>
      %c0_12 = arith.constant 0 : index
      %c0_13 = arith.constant 0 : index
      %13 = vector.load %arg5[%c0_12, %c0_13] : memref<1x128xf32, #tpu.memory_space<vmem>>, vector<1x128xf32>
      %14 = vector.broadcast %13 : vector<1x128xf32> to vector<256x128xf32>
      %15 = arith.addf %12, %14 : vector<256x128xf32>
      %c0_14 = arith.constant 0 : index
      %c0_15 = arith.constant 0 : index
      %16 = vector.load %arg6[%c0_14, %c0_15] : memref<256x128xf32, #tpu.memory_space<vmem>>, vector<256x128xf32>
      tpu.vector_store %arg6[%c0_14, %c0_15], %15 {strides = array<i32>} : memref<256x128xf32, #tpu.memory_space<vmem>>, vector<256x128xf32>,
    } else {
    }
    return
  }
  func.func @transform_0(%arg0: i32, %arg1: i32, %arg2: i32) -> (i32, i32) {
    %c0_i32 = arith.constant 0 : i32
    return %arg0, %arg2 : i32, i32
  }
  func.func @transform_1(%arg0: i32, %arg1: i32, %arg2: i32) -> (i32, i32) {
    %c0_i32 = arith.constant 0 : i32
    return %arg2, %arg1 : i32, i32
  }
  func.func @transform_2(%arg0: i32, %arg1: i32, %arg2: i32) -> (i32, i32) {
    %c0_i32 = arith.constant 0 : i32
    %c0_i32_0 = arith.constant 0 : i32
    return %c0_i32, %arg1 : i32, i32
  }
  func.func @transform_3(%arg0: i32, %arg1: i32, %arg2: i32) -> (i32, i32) {
    %c0_i32 = arith.constant 0 : i32
    return %arg0, %arg1 : i32, i32
  }
}

</mosaic_0001>

<bundles_post_ra>
// kernel: tpu_custom_call.1
= control target key start
LH: loop header
LB: loop body
LE: loop exit
PB: predicated region body
PF: predicated region fallthrough
CT: control target
= control target key end

     0   :  { %8 = vsyncpa [#allocation4], 0  ;;  %s969_s0 = inlined_call_operand.hbm [shape: bf16[256,128], index: 0, kind: input, shape index: {}]   ;;  %s970_s1 = inlined_call_operand.hbm [shape: bf16[128,128], index: 1, kind: input, shape index: {}]   ;;  %s971_s2 = inlined_call_operand.vmem [shape: f32[1,128], index: 2, kind: input, shape index: {}]   ;;  %s972_s3 = inlined_call_operand.hbm [shape: f32[256,128], index: 3, kind: output, shape index: {}]  }
   0x1   :  { %9 = vsyncpa [#allocation7], 0 }
   0x2   :  { %10 = vsyncpa [#allocation5], 0  ;;  %s869_s12 = smov [#allocation3]   ;;  %s797_s16 = scalar_lea.hbm %s969_s0, 2048 }
   0x3   :  { %s16_s13 = sshll.u32 %s869_s12, 4  ;;  %p798_p0 = scmp.ne.s32.totalorder %s969_s0, %s797_s16  ;;  %s17_s13 = int_to_ptr.vmem [resolvable:$true] %s16_s13 }
   0x4   :  { %p801_p1 = scmp.lt.u32.totalorder %s797_s16, %s969_s0 }
   0x6   :  { %p803_p2 = pnand %p801_p1, %p798_p0 }
   0x8   :  { %806 = shalt.err (!%p803_p2)
}
   0x9   :  { %s807_s21 = scalar_lea.vmem %s17_s13, 2048  ;;  %p812_p4 = scmp.lt.s32.totalorder %s17_s13, %s17_s13 }
   0xa   :  { %p808_p3 = scmp.ne.s32.totalorder %s17_s13, %s807_s21  ;;  %p813_p5 = scmp.lt.s32.totalorder %s807_s21, %s807_s21 }
   0xc   :  { %p814_p6 = por %p813_p5, %p812_p4 }
   0xe   :  { %p815_p7 = pnand %p814_p6, %p808_p3 }
  0x10   :  { %818 = shalt.err (!%p815_p7)
}
  0x11   :  { %s870_s22 = smov 64   ;;  %s871_s23 = smov 4  }
  0x12   :  { %22 = dma.hbm_to_vmem [thread:$0]  %s969_s0, 2048, %s17_s13, [#allocation4], %s870_s22, %s870_s22, %s871_s23  }
  0x13   :  { %s872_s26 = smov [#allocation6]   ;;  %s819_s30 = scalar_lea.hbm %s970_s1, 1024 }
  0x14   :  { %s28_s27 = sshll.u32 %s872_s26, 4  ;;  %p820_p8 = scmp.ne.s32.totalorder %s970_s1, %s819_s30  ;;  %s29_s27 = int_to_ptr.vmem [resolvable:$true] %s28_s27 }
  0x15   :  { %p823_p9 = scmp.lt.u32.totalorder %s819_s30, %s970_s1 }
  0x17   :  { %p825_p10 = pnand %p823_p9, %p820_p8 }
  0x19   :  { %828 = shalt.err (!%p825_p10)
}
  0x1a   :  { %s829_s8 = scalar_lea.vmem %s29_s27, 1024  ;;  %p834_p12 = scmp.lt.s32.totalorder %s29_s27, %s29_s27 }
  0x1b   :  { %p830_p11 = scmp.ne.s32.totalorder %s29_s27, %s829_s8  ;;  %p835_p13 = scmp.lt.s32.totalorder %s829_s8, %s829_s8 }
  0x1d   :  { %p836_p0 = por %p835_p13, %p834_p12 }
  0x1f   :  { %p837_p1 = pnand %p836_p0, %p830_p11 }
  0x21   :  { %840 = shalt.err (!%p837_p1)
}
  0x22   :  { %34 = dma.hbm_to_vmem [thread:$0]  %s970_s1, 1024, %s29_s27, [#allocation7], %s870_s22, %s870_s22, %s871_s23  }
  0x23   :  { %863 = dma.done.wait [#allocation4], 2048  }
  0x24   :  { %864 = vsyncadd [#allocation4], 4294965248 }
  0x25   :  { %865 = dma.done.wait [#allocation7], 1024  }
  0x26   :  { %866 = vsyncadd [#allocation7], 4294966272  ;;  %v773_v0 = vld [vmem:[#allocation6] sm:$0xff]   ;;  %v774_v1 = vld [vmem:[#allocation6 + $0x8] sm:$0xff]  }
  0x27   :  { %702 = vmatprep.subr.bf16.mxu0 %v773_v0  ;;  %750 = vmatprep.subr.bf16.mxu1 %v773_v0  ;;  %v775_v2 = vld [vmem:[#allocation6 + $0x10] sm:$0xff]   ;;  %v776_v3 = vld [vmem:[#allocation6 + $0x18] sm:$0xff]   ;;  %v781_v4 = vld [vmem:[#allocation3] sm:$0xff]  }
  0x28   :  { %703 = vmatpush3.bf16.msra.mxu0 %v773_v0  ;;  %758 = vmatpush3.bf16.msra.mxu1 %v773_v0  ;;  %v782_v5 = vld [vmem:[#allocation3 + $0x40] sm:$0xff]   ;;  %v778_v7 = vld [vmem:[#allocation6 + $0x28] sm:$0xff]   ;;  %v779_v8 = vld [vmem:[#allocation6 + $0x30] sm:$0xff]  }
  0x29   :  { %704 = vmatprep.subr.bf16.mxu0 %v774_v1  ;;  %751 = vmatprep.subr.bf16.mxu1 %v774_v1  ;;  %v777_v6 = vld [vmem:[#allocation6 + $0x20] sm:$0xff]   ;;  %v780_v9 = vld [vmem:[#allocation6 + $0x38] sm:$0xff]   ;;  %v783_v10 = vld [vmem:[#allocation3 + $0x8] sm:$0xff]  }
  0x2a   :  { %718 = vmatprep.mubr.bf16.mxu0 %v781_v4  ;;  %734 = vmatprep.mubr.bf16.mxu1 %v782_v5  ;;  %v784_v11 = vld [vmem:[#allocation3 + $0x48] sm:$0xff]   ;;  %v785_v12 = vld [vmem:[#allocation3 + $0x10] sm:$0xff]   ;;  %v787_v14 = vld [vmem:[#allocation3 + $0x18] sm:$0xff]  }
  0x2b   :  { %v786_v13 = vld [vmem:[#allocation3 + $0x50] sm:$0xff]   ;;  %v788_v15 = vld [vmem:[#allocation3 + $0x58] sm:$0xff]   ;;  %v789_v16 = vld [vmem:[#allocation3 + $0x20] sm:$0xff]  }
  0x2c   :  { %705 = vmatpush3.bf16.msra.mxu0 %v774_v1  ;;  %759 = vmatpush3.bf16.msra.mxu1 %v774_v1  ;;  %v790_v17 = vld [vmem:[#allocation3 + $0x60] sm:$0xff]   ;;  %v791_v18 = vld [vmem:[#allocation3 + $0x28] sm:$0xff]   ;;  %v793_v20 = vld [vmem:[#allocation3 + $0x30] sm:$0xff]  }
  0x2d   :  { %706 = vmatprep.subr.bf16.mxu0 %v775_v2  ;;  %752 = vmatprep.subr.bf16.mxu1 %v775_v2  ;;  %v792_v19 = vld [vmem:[#allocation3 + $0x68] sm:$0xff]   ;;  %v794_v21 = vld [vmem:[#allocation3 + $0x70] sm:$0xff]   ;;  %v795_v22 = vld [vmem:[#allocation3 + $0x38] sm:$0xff]  }
  0x2e   :  { %v796_v23 = vld [vmem:[#allocation3 + $0x78] sm:$0xff]   ;;  %v923_v24 = vld [vmem:[%s971_s2] ss:$0 sm:$0xff]  ;;  %s873_s2 = smov [#allocation8]  }
  0x2f   :  { %s640_s11 = sshll.u32 %s873_s2, 4  ;;  %s641_s11 = int_to_ptr.vmem [resolvable:$true] %s640_s11 }
  0x30   :  { %707 = vmatpush3.bf16.msra.mxu0 %v775_v2  ;;  %760 = vmatpush3.bf16.msra.mxu1 %v775_v2  ;;  %s841_s12 = scalar_lea.vmem %s641_s11, 4096  ;;  %p846_p3 = scmp.lt.s32.totalorder %s641_s11, %s641_s11 }
  0x31   :  { %708 = vmatprep.subr.bf16.mxu0 %v776_v3  ;;  %753 = vmatprep.subr.bf16.mxu1 %v776_v3  ;;  %p842_p2 = scmp.ne.s32.totalorder %s641_s11, %s841_s12  ;;  %p847_p4 = scmp.lt.s32.totalorder %s841_s12, %s841_s12 }
  0x33   :  { %p848_p5 = por %p847_p4, %p846_p3 }
  0x34   :  { %709 = vmatpush3.bf16.msra.mxu0 %v776_v3  ;;  %761 = vmatpush3.bf16.msra.mxu1 %v776_v3 }
  0x35   :  { %710 = vmatprep.subr.bf16.mxu0 %v777_v6  ;;  %754 = vmatprep.subr.bf16.mxu1 %v777_v6  ;;  %p849_p6 = pnand %p848_p5, %p842_p2 }
  0x38   :  { %711 = vmatpush3.bf16.msra.mxu0 %v777_v6  ;;  %762 = vmatpush3.bf16.msra.mxu1 %v777_v6 }
  0x39   :  { %712 = vmatprep.subr.bf16.mxu0 %v778_v7  ;;  %755 = vmatprep.subr.bf16.mxu1 %v778_v7 }
  0x3c   :  { %713 = vmatpush3.bf16.msra.mxu0 %v778_v7  ;;  %763 = vmatpush3.bf16.msra.mxu1 %v778_v7 }
  0x3d   :  { %714 = vmatprep.subr.bf16.mxu0 %v779_v8  ;;  %756 = vmatprep.subr.bf16.mxu1 %v779_v8 }
  0x40   :  { %715 = vmatpush3.bf16.msra.mxu0 %v779_v8  ;;  %764 = vmatpush3.bf16.msra.mxu1 %v779_v8 }
  0x41   :  { %716 = vmatprep.subr.bf16.mxu0 %v780_v9  ;;  %757 = vmatprep.subr.bf16.mxu1 %v780_v9 }
  0x44   :  { %717 = vmatpush3.bf16.msra.mxu0 %v780_v9  ;;  %765 = vmatpush3.bf16.msra.mxu1 %v780_v9 }
  0x47   :  { %719 = vmatmul.mubr.bf16.vlgmr.msra.gmra.mrb[0].mxu0 %v783_v10  ;;  %735 = vmatmul.mubr.bf16.vlgmr.msra.gmra.mrb[0].mxu1 %v784_v11 }
  0x48   :  { %722 = vmatprep.mubr.bf16.mxu0 %v785_v12  ;;  %738 = vmatprep.mubr.bf16.mxu1 %v786_v13 }
  0x4f   :  { %723 = vmatmul.mubr.bf16.gmra.mrb[4].mxu0 %v787_v14  ;;  %739 = vmatmul.mubr.bf16.gmra.mrb[4].mxu1 %v788_v15 }
  0x50   :  { %726 = vmatprep.mubr.bf16.mxu0 %v789_v16  ;;  %742 = vmatprep.mubr.bf16.mxu1 %v790_v17 }
  0x57   :  { %727 = vmatmul.mubr.bf16.gmra.mrb[8].mxu0 %v791_v18  ;;  %743 = vmatmul.mubr.bf16.gmra.mrb[8].mxu1 %v792_v19 }
  0x58   :  { %730 = vmatprep.mubr.bf16.mxu0 %v793_v20  ;;  %746 = vmatprep.mubr.bf16.mxu1 %v794_v21 }
  0x5f   :  { %731 = vmatmul.mubr.bf16.gmra.mrb[12].mxu0 %v795_v22  ;;  %747 = vmatmul.mubr.bf16.gmra.mrb[12].mxu1 %v796_v23 }
 0x11a   :  { %v720_v25 = vpop.f32.mrb[0].mxu0  ;;  %v736_v26 = vpop.f32.mrb[0].mxu1 }
 0x11b   :  { %v573_v27 = vadd.f32 %v720_v25, %v923_v24  ;;  %v589_v28 = vadd.f32 %v736_v26, %v923_v24  ;;  %v338_v29 = vpop.f32.mrb[1].mxu0  ;;  %v402_v30 = vpop.f32.mrb[1].mxu1 }
 0x11c   :  { %v571_v31 = vadd.f32 %v923_v24, %v338_v29  ;;  %v587_v32 = vadd.f32 %v923_v24, %v402_v30  ;;  %v721_v33 = vpop.f32.mrb[2].mxu0  ;;  %v737_v34 = vpop.f32.mrb[2].mxu1 }
 0x11d   :  { %605 = vst [vmem:[#allocation8 + $0x10] sm:$0xff] %v573_v27  ;;  %621 = vst [vmem:[#allocation8 + $0x90] sm:$0xff] %v589_v28  ;;  %v574_v35 = vadd.f32 %v721_v33, %v923_v24  ;;  %v590_v36 = vadd.f32 %v737_v34, %v923_v24  ;;  %v341_v37 = vpop.f32.mrb[3].mxu0  ;;  %v405_v38 = vpop.f32.mrb[3].mxu1 }
 0x11e   :  { %603 = vst [vmem:[#allocation8] sm:$0xff] %v571_v31  ;;  %619 = vst [vmem:[#allocation8 + $0x80] sm:$0xff] %v587_v32  ;;  %v572_v39 = vadd.f32 %v923_v24, %v341_v37  ;;  %v588_v40 = vadd.f32 %v923_v24, %v405_v38 }
 0x11f   :  { %606 = vst [vmem:[#allocation8 + $0x18] sm:$0xff] %v574_v35  ;;  %622 = vst [vmem:[#allocation8 + $0x98] sm:$0xff] %v590_v36 }
 0x120   :  { %604 = vst [vmem:[#allocation8 + $0x8] sm:$0xff] %v572_v39  ;;  %620 = vst [vmem:[#allocation8 + $0x88] sm:$0xff] %v588_v40 }
 0x122   :  { %v724_v41 = vpop.f32.mrb[4].mxu0  ;;  %v740_v42 = vpop.f32.mrb[4].mxu1 }
 0x123   :  { %v577_v43 = vadd.f32 %v724_v41, %v923_v24  ;;  %v593_v44 = vadd.f32 %v740_v42, %v923_v24  ;;  %v354_v45 = vpop.f32.mrb[5].mxu0  ;;  %v418_v46 = vpop.f32.mrb[5].mxu1 }
 0x124   :  { %v575_v47 = vadd.f32 %v923_v24, %v354_v45  ;;  %v591_v48 = vadd.f32 %v923_v24, %v418_v46  ;;  %v725_v49 = vpop.f32.mrb[6].mxu0  ;;  %v741_v50 = vpop.f32.mrb[6].mxu1 }
 0x125   :  { %609 = vst [vmem:[#allocation8 + $0x30] sm:$0xff] %v577_v43  ;;  %625 = vst [vmem:[#allocation8 + $0xb0] sm:$0xff] %v593_v44  ;;  %v578_v51 = vadd.f32 %v725_v49, %v923_v24  ;;  %v594_v52 = vadd.f32 %v741_v50, %v923_v24  ;;  %v357_v53 = vpop.f32.mrb[7].mxu0  ;;  %v421_v54 = vpop.f32.mrb[7].mxu1 }
 0x126   :  { %607 = vst [vmem:[#allocation8 + $0x20] sm:$0xff] %v575_v47  ;;  %623 = vst [vmem:[#allocation8 + $0xa0] sm:$0xff] %v591_v48  ;;  %v576_v55 = vadd.f32 %v923_v24, %v357_v53  ;;  %v592_v56 = vadd.f32 %v923_v24, %v421_v54 }
 0x127   :  { %610 = vst [vmem:[#allocation8 + $0x38] sm:$0xff] %v578_v51  ;;  %626 = vst [vmem:[#allocation8 + $0xb8] sm:$0xff] %v594_v52 }
 0x128   :  { %608 = vst [vmem:[#allocation8 + $0x28] sm:$0xff] %v576_v55  ;;  %624 = vst [vmem:[#allocation8 + $0xa8] sm:$0xff] %v592_v56 }
 0x12a   :  { %v728_v57 = vpop.f32.mrb[8].mxu0  ;;  %v744_v58 = vpop.f32.mrb[8].mxu1 }
 0x12b   :  { %v581_v59 = vadd.f32 %v728_v57, %v923_v24  ;;  %v597_v60 = vadd.f32 %v744_v58, %v923_v24  ;;  %v370_v61 = vpop.f32.mrb[9].mxu0  ;;  %v434_v62 = vpop.f32.mrb[9].mxu1 }
 0x12c   :  { %v579_v63 = vadd.f32 %v923_v24, %v370_v61  ;;  %v595_v0 = vadd.f32 %v923_v24, %v434_v62  ;;  %v729_v1 = vpop.f32.mrb[10].mxu0  ;;  %v745_v2 = vpop.f32.mrb[10].mxu1 }
 0x12d   :  { %613 = vst [vmem:[#allocation8 + $0x50] sm:$0xff] %v581_v59  ;;  %629 = vst [vmem:[#allocation8 + $0xd0] sm:$0xff] %v597_v60  ;;  %v582_v3 = vadd.f32 %v729_v1, %v923_v24  ;;  %v598_v4 = vadd.f32 %v745_v2, %v923_v24  ;;  %v373_v5 = vpop.f32.mrb[11].mxu0  ;;  %v437_v6 = vpop.f32.mrb[11].mxu1 }
 0x12e   :  { %611 = vst [vmem:[#allocation8 + $0x40] sm:$0xff] %v579_v63  ;;  %627 = vst [vmem:[#allocation8 + $0xc0] sm:$0xff] %v595_v0  ;;  %v580_v7 = vadd.f32 %v923_v24, %v373_v5  ;;  %v596_v8 = vadd.f32 %v923_v24, %v437_v6 }
 0x12f   :  { %614 = vst [vmem:[#allocation8 + $0x58] sm:$0xff] %v582_v3  ;;  %630 = vst [vmem:[#allocation8 + $0xd8] sm:$0xff] %v598_v4 }
 0x130   :  { %612 = vst [vmem:[#allocation8 + $0x48] sm:$0xff] %v580_v7  ;;  %628 = vst [vmem:[#allocation8 + $0xc8] sm:$0xff] %v596_v8 }
 0x132   :  { %v732_v9 = vpop.f32.mrb[12].mxu0  ;;  %v748_v10 = vpop.f32.mrb[12].mxu1 }
 0x133   :  { %v585_v11 = vadd.f32 %v732_v9, %v923_v24  ;;  %v601_v12 = vadd.f32 %v748_v10, %v923_v24  ;;  %v386_v13 = vpop.f32.mrb[13].mxu0  ;;  %v450_v14 = vpop.f32.mrb[13].mxu1 }
 0x134   :  { %v583_v15 = vadd.f32 %v923_v24, %v386_v13  ;;  %v599_v16 = vadd.f32 %v923_v24, %v450_v14  ;;  %v733_v17 = vpop.f32.mrb[14].mxu0  ;;  %v749_v18 = vpop.f32.mrb[14].mxu1 }
 0x135   :  { %617 = vst [vmem:[#allocation8 + $0x70] sm:$0xff] %v585_v11  ;;  %633 = vst [vmem:[#allocation8 + $0xf0] sm:$0xff] %v601_v12  ;;  %v586_v19 = vadd.f32 %v733_v17, %v923_v24  ;;  %v602_v20 = vadd.f32 %v749_v18, %v923_v24  ;;  %v389_v21 = vpop.f32.mrb[15].mxu0  ;;  %v453_v22 = vpop.f32.mrb[15].mxu1 }
 0x136   :  { %615 = vst [vmem:[#allocation8 + $0x60] sm:$0xff] %v583_v15  ;;  %631 = vst [vmem:[#allocation8 + $0xe0] sm:$0xff] %v599_v16  ;;  %v584_v23 = vadd.f32 %v923_v24, %v389_v21  ;;  %v600_v25 = vadd.f32 %v923_v24, %v453_v22 }
 0x137   :  { %618 = vst [vmem:[#allocation8 + $0x78] sm:$0xff] %v586_v19  ;;  %634 = vst [vmem:[#allocation8 + $0xf8] sm:$0xff] %v602_v20 }
 0x138   :  { %616 = vst [vmem:[#allocation8 + $0x68] sm:$0xff] %v584_v23  ;;  %632 = vst [vmem:[#allocation8 + $0xe8] sm:$0xff] %v600_v25 }
 0x139   :  { %852 = shalt.err (!%p849_p6)
}
 0x13a   :  { %s853_s15 = scalar_lea.hbm %s972_s3, 4096 }
 0x13b   :  { %p854_p7 = scmp.ne.s32.totalorder %s972_s3, %s853_s15  ;;  %p857_p8 = scmp.lt.u32.totalorder %s853_s15, %s972_s3 }
 0x13d   :  { %p859_p9 = pnand %p857_p8, %p854_p7 }
 0x13f   :  { %862 = shalt.err (!%p859_p9)
}
 0x140   :  { %s874_s20 = smov 128   ;;  %s875_s21 = smov 8  }
 0x141   :  { %646 = dma.vmem_to_hbm [thread:$0]  %s641_s11, 4096, %s972_s3, [#allocation5], %s874_s20, %s874_s20, %s875_s21  }
 0x142   :  { %867 = dma.done.wait [#allocation5], 4096  }
 0x143   :  { %868 = vsyncadd [#allocation5], 4294963200 }
 0x144   :  { %650 = vsyncpa [#allocation4], 1 }
 0x145   :  { %651 = vsyncpa [#allocation7], 1 }
 0x146   :  { %652 = vsyncpa [#allocation5], 1 }

</bundles_post_ra>
